<compile_context>
chip_gen: v6e
topology: v6e:2x2x1
jax: 0.10.0
libtpu: 0.0.40
codegen_flags: <defaults>
</compile_context>

<pallas_src>
import jax
import jax.numpy as jnp
from jax import lax
from jax.experimental import pallas as pl
from jax.experimental.pallas import tpu as pltpu
import numpy as np


def _basnet_loss_kernel(alpha_ref, score_base_ref, score_supp_ref,
                        label_ref, fore_w_ref, out_ref):
    f32 = jnp.float32
    lbl = label_ref[...].astype(f32)          # (B, C+1), background column == 0
    B, C1 = lbl.shape
    C = C1 - 1

    sb = score_base_ref[...].astype(f32)      # (B, C+1)
    ss = score_supp_ref[...].astype(f32)      # (B, C+1)
    fw = fore_w_ref[...].astype(f32)          # (B, T)

    # --- label normalization (background column synthesized via lane mask) --
    sum_l = jnp.sum(lbl, axis=1, keepdims=True)          # (B, 1)
    inv_base = 1.0 / (sum_l + 1.0)                       # row-sum of cat(label, 1)
    inv_supp = 1.0 / sum_l                               # row-sum of cat(label, 0)
    # (parity with PyTorch: an all-zero label row gives NaN in loss_supp)

    col = lax.broadcasted_iota(jnp.int32, (B, C1), 1)
    is_bg = col == C
    t_base = jnp.where(is_bg, 1.0, lbl) * inv_base       # cat(label, 1) / (sum+1)
    t_supp = lbl * inv_supp                              # bg column already 0

    def bce_sum(p, t):
        # PyTorch nn.BCELoss clamps log terms at -100; full-width (B, C+1).
        lp = jnp.maximum(jnp.log(p), -100.0)
        l1p = jnp.maximum(jnp.log(1.0 - p), -100.0)
        return jnp.sum(-(t * lp + (1.0 - t) * l1p), keepdims=True)   # (1, 1)

    inv_bce = 1.0 / float(B * C1)
    inv_b = 1.0 / float(B)

    loss_base = bce_sum(sb, t_base) * inv_bce            # (1, 1)
    loss_supp = bce_sum(ss, t_supp) * inv_bce            # (1, 1)
    loss_norm = jnp.sum(jnp.abs(fw), keepdims=True) * inv_b   # (1, 1)

    alpha = alpha_ref[0]
    loss_total = loss_base + loss_supp + alpha * loss_norm

    # --- four scalar stores straight to the SMEM output ---------------------
    out_ref[0] = loss_base[0, 0]
    out_ref[1] = loss_supp[0, 0]
    out_ref[2] = loss_norm[0, 0]
    out_ref[3] = loss_total[0, 0]


def basnet_loss(score_base, score_supp, fore_weights, label, alpha):
    """Pallas implementation of BaS_Net_loss.forward.

    Returns (loss_total, dict) with scalar float32 entries matching the
    PyTorch module's semantics.
    """
    B, C = label.shape
    # Pad label with a zero background column so the kernel works on one
    # full-width (B, C+1) block (no in-kernel lane slicing / concatenation).
    label_pad = jnp.pad(label.astype(jnp.float32), ((0, 0), (0, 1)))
    alpha_arr = jnp.asarray(alpha, dtype=jnp.float32).reshape(1)

    vmem = pl.BlockSpec(memory_space=pltpu.MemorySpace.VMEM)
    smem = pl.BlockSpec(memory_space=pltpu.MemorySpace.SMEM)

    cost = pl.CostEstimate(
        flops=int(14 * B * (C + 1) + 2 * fore_weights.size + 16),
        transcendentals=int(4 * B * (C + 1)),
        bytes_accessed=int(score_base.nbytes + score_supp.nbytes
                           + label_pad.nbytes + fore_weights.nbytes + 4 + 16),
    )

    packed = pl.pallas_call(
        _basnet_loss_kernel,
        out_shape=jax.ShapeDtypeStruct((4,), jnp.float32),
        in_specs=[smem, vmem, vmem, vmem, vmem],
        out_specs=smem,
        cost_estimate=cost,
    )(alpha_arr, score_base, score_supp, label_pad, fore_weights)

    loss = {
        "loss_base": packed[0],
        "loss_supp": packed[1],
        "loss_norm": packed[2],
        "loss_total": packed[3],
    }
    return loss["loss_total"], loss


def _reference(score_base, score_supp, fore_weights, label, alpha):
    """Pure-JAX reference mirroring the PyTorch module."""
    B = label.shape[0]
    label_base = jnp.concatenate([label, jnp.ones((B, 1), label.dtype)], axis=1)
    label_supp = jnp.concatenate([label, jnp.zeros((B, 1), label.dtype)], axis=1)
    label_base = label_base / jnp.sum(label_base, axis=1, keepdims=True)
    label_supp = label_supp / jnp.sum(label_supp, axis=1, keepdims=True)

    def bce(s, t):
        lp = jnp.maximum(jnp.log(s), -100.0)
        l1p = jnp.maximum(jnp.log(1.0 - s), -100.0)
        return jnp.mean(-(t * lp + (1.0 - t) * l1p))

    lb = bce(score_base, label_base)
    lsup = bce(score_supp, label_supp)
    lnorm = jnp.mean(jnp.sum(jnp.abs(fore_weights), axis=1))
    return lb, lsup, lnorm, lb + lsup + alpha * lnorm


if __name__ == "__main__":
    key = jax.random.PRNGKey(0)
    B, C, T = 2, 4, 8          # batch, num action classes, temporal length
    alpha = 0.0001             # BaS-Net default sparsity weight

    k1, k2, k3, k4 = jax.random.split(key, 4)
    score_base = jax.random.uniform(k1, (B, C + 1), jnp.float32, 1e-4, 1.0 - 1e-4)
    score_supp = jax.random.uniform(k2, (B, C + 1), jnp.float32, 1e-4, 1.0 - 1e-4)
    fore_weights = jax.random.uniform(k3, (B, T), jnp.float32)
    label = (jax.random.uniform(k4, (B, C), jnp.float32) > 0.5).astype(jnp.float32)
    # Guarantee at least one positive per row (matches typical data; avoids the
    # 0/0 NaN that both PyTorch and this kernel would otherwise produce).
    label = label.at[:, 0].set(1.0)

    loss_total, loss = basnet_loss(score_base, score_supp, fore_weights, label, alpha)
    loss_total = jax.block_until_ready(loss_total)

    rb, rs, rn, rt = _reference(score_base, score_supp, fore_weights, label, alpha)
    np.testing.assert_allclose(np.asarray(loss["loss_base"]), np.asarray(rb),
                               rtol=1e-5, atol=1e-5)
    np.testing.assert_allclose(np.asarray(loss["loss_supp"]), np.asarray(rs),
                               rtol=1e-5, atol=1e-5)
    np.testing.assert_allclose(np.asarray(loss["loss_norm"]), np.asarray(rn),
                               rtol=1e-5, atol=1e-5)
    np.testing.assert_allclose(np.asarray(loss_total), np.asarray(rt),
                               rtol=1e-5, atol=1e-5)

    print("KERNEL_OK")
</pallas_src>

<mosaic_0001>
module attributes {stable_mosaic.version = 11 : i64} {
  func.func @_basnet_loss_kernel(%arg0: memref<1xf32, #tpu.memory_space<smem>>, %arg1: memref<2x5xf32, #tpu.memory_space<vmem>>, %arg2: memref<2x5xf32, #tpu.memory_space<vmem>>, %arg3: memref<2x5xf32, #tpu.memory_space<vmem>>, %arg4: memref<2x8xf32, #tpu.memory_space<vmem>>, %arg5: memref<4xf32, #tpu.memory_space<smem>>) attributes {dimension_semantics = [], scalar_prefetch = 0 : i64, scratch_operands = 0 : i64, tpu.core_type = #tpu.core_type<tc>} {
    %c0 = arith.constant 0 : index
    %c0_0 = arith.constant 0 : index
    %0 = vector.load %arg3[%c0, %c0_0] : memref<2x5xf32, #tpu.memory_space<vmem>>, vector<2x5xf32>
    %c0_1 = arith.constant 0 : index
    %c0_2 = arith.constant 0 : index
    %1 = vector.load %arg1[%c0_1, %c0_2] : memref<2x5xf32, #tpu.memory_space<vmem>>, vector<2x5xf32>
    %c0_3 = arith.constant 0 : index
    %c0_4 = arith.constant 0 : index
    %2 = vector.load %arg2[%c0_3, %c0_4] : memref<2x5xf32, #tpu.memory_space<vmem>>, vector<2x5xf32>
    %c0_5 = arith.constant 0 : index
    %c0_6 = arith.constant 0 : index
    %3 = vector.load %arg4[%c0_5, %c0_6] : memref<2x8xf32, #tpu.memory_space<vmem>>, vector<2x8xf32>
    %cst = arith.constant dense<0.000000e+00> : vector<2xf32>
    %4 = vector.multi_reduction <add>, %0, %cst [1] : vector<2x5xf32> to vector<2xf32>
    %5 = vector.shape_cast %4 : vector<2xf32> to vector<2x1xf32>
    %cst_7 = arith.constant 1.000000e+00 : f32
    %6 = vector.broadcast %cst_7 : f32 to vector<2x1xf32>
    %7 = arith.addf %5, %6 : vector<2x1xf32>
    %cst_8 = arith.constant 1.000000e+00 : f32
    %8 = vector.broadcast %cst_8 : f32 to vector<2x1xf32>
    %9 = arith.divf %8, %7 : vector<2x1xf32>
    %cst_9 = arith.constant 1.000000e+00 : f32
    %10 = vector.broadcast %cst_9 : f32 to vector<2x1xf32>
    %11 = arith.divf %10, %5 : vector<2x1xf32>
    %12 = tpu.iota {dimensions = array<i32: 1>} : vector<2x5xi32>
    %c4_i32 = arith.constant 4 : i32
    %13 = vector.broadcast %c4_i32 : i32 to vector<2x5xi32>
    %14 = arith.cmpi eq, %12, %13 : vector<2x5xi32>
    %cst_10 = arith.constant 1.000000e+00 : f32
    %15 = vector.broadcast %cst_10 : f32 to vector<2x5xf32>
    %16 = arith.select %14, %15, %0 : vector<2x5xi1>, vector<2x5xf32>
    %17 = vector.broadcast %9 : vector<2x1xf32> to vector<2x5xf32>
    %18 = arith.mulf %16, %17 : vector<2x5xf32>
    %19 = vector.broadcast %11 : vector<2x1xf32> to vector<2x5xf32>
    %20 = arith.mulf %0, %19 : vector<2x5xf32>
    %21 = math.log %1 : vector<2x5xf32>
    %cst_11 = arith.constant -1.000000e+02 : f32
    %22 = vector.broadcast %cst_11 : f32 to vector<2x5xf32>
    %23 = arith.maximumf %21, %22 : vector<2x5xf32>
    %cst_12 = arith.constant 1.000000e+00 : f32
    %24 = vector.broadcast %cst_12 : f32 to vector<2x5xf32>
    %25 = arith.subf %24, %1 : vector<2x5xf32>
    %26 = math.log %25 : vector<2x5xf32>
    %cst_13 = arith.constant -1.000000e+02 : f32
    %27 = vector.broadcast %cst_13 : f32 to vector<2x5xf32>
    %28 = arith.maximumf %26, %27 : vector<2x5xf32>
    %29 = arith.mulf %18, %23 : vector<2x5xf32>
    %cst_14 = arith.constant 1.000000e+00 : f32
    %30 = vector.broadcast %cst_14 : f32 to vector<2x5xf32>
    %31 = arith.subf %30, %18 : vector<2x5xf32>
    %32 = arith.mulf %31, %28 : vector<2x5xf32>
    %33 = arith.addf %29, %32 : vector<2x5xf32>
    %cst_15 = arith.constant 0.000000e+00 : f32
    %34 = vector.broadcast %cst_15 : f32 to vector<2x5xf32>
    %35 = arith.subf %34, %33 : vector<2x5xf32>
    %36 = vector.shape_cast %35 : vector<2x5xf32> to vector<1x2x5xf32>
    %cst_16 = arith.constant dense<0.000000e+00> : vector<1xf32>
    %37 = vector.multi_reduction <add>, %36, %cst_16 [1, 2] : vector<1x2x5xf32> to vector<1xf32>
    %38 = vector.shape_cast %37 : vector<1xf32> to vector<1x1x1xf32>
    %39 = vector.extract %38[0, 0, 0] : f32 from vector<1x1x1xf32>
    %40 = vector.broadcast %39 : f32 to vector<1x1xf32>
    %cst_17 = arith.constant 1.000000e-01 : f32
    %41 = vector.broadcast %cst_17 : f32 to vector<1x1xf32>
    %42 = arith.mulf %40, %41 : vector<1x1xf32>
    %43 = math.log %2 : vector<2x5xf32>
    %cst_18 = arith.constant -1.000000e+02 : f32
    %44 = vector.broadcast %cst_18 : f32 to vector<2x5xf32>
    %45 = arith.maximumf %43, %44 : vector<2x5xf32>
    %cst_19 = arith.constant 1.000000e+00 : f32
    %46 = vector.broadcast %cst_19 : f32 to vector<2x5xf32>
    %47 = arith.subf %46, %2 : vector<2x5xf32>
    %48 = math.log %47 : vector<2x5xf32>
    %cst_20 = arith.constant -1.000000e+02 : f32
    %49 = vector.broadcast %cst_20 : f32 to vector<2x5xf32>
    %50 = arith.maximumf %48, %49 : vector<2x5xf32>
    %51 = arith.mulf %20, %45 : vector<2x5xf32>
    %cst_21 = arith.constant 1.000000e+00 : f32
    %52 = vector.broadcast %cst_21 : f32 to vector<2x5xf32>
    %53 = arith.subf %52, %20 : vector<2x5xf32>
    %54 = arith.mulf %53, %50 : vector<2x5xf32>
    %55 = arith.addf %51, %54 : vector<2x5xf32>
    %cst_22 = arith.constant 0.000000e+00 : f32
    %56 = vector.broadcast %cst_22 : f32 to vector<2x5xf32>
    %57 = arith.subf %56, %55 : vector<2x5xf32>
    %58 = vector.shape_cast %57 : vector<2x5xf32> to vector<1x2x5xf32>
    %cst_23 = arith.constant dense<0.000000e+00> : vector<1xf32>
    %59 = vector.multi_reduction <add>, %58, %cst_23 [1, 2] : vector<1x2x5xf32> to vector<1xf32>
    %60 = vector.shape_cast %59 : vector<1xf32> to vector<1x1x1xf32>
    %61 = vector.extract %60[0, 0, 0] : f32 from vector<1x1x1xf32>
    %62 = vector.broadcast %61 : f32 to vector<1x1xf32>
    %cst_24 = arith.constant 1.000000e-01 : f32
    %63 = vector.broadcast %cst_24 : f32 to vector<1x1xf32>
    %64 = arith.mulf %62, %63 : vector<1x1xf32>
    %65 = math.absf %3 : vector<2x8xf32>
    %66 = vector.shape_cast %65 : vector<2x8xf32> to vector<1x2x8xf32>
    %cst_25 = arith.constant dense<0.000000e+00> : vector<1xf32>
    %67 = vector.multi_reduction <add>, %66, %cst_25 [1, 2] : vector<1x2x8xf32> to vector<1xf32>
    %68 = vector.shape_cast %67 : vector<1xf32> to vector<1x1x1xf32>
    %69 = vector.extract %68[0, 0, 0] : f32 from vector<1x1x1xf32>
    %70 = vector.broadcast %69 : f32 to vector<1x1xf32>
    %cst_26 = arith.constant 5.000000e-01 : f32
    %71 = vector.broadcast %cst_26 : f32 to vector<1x1xf32>
    %72 = arith.mulf %70, %71 : vector<1x1xf32>
    %c0_27 = arith.constant 0 : index
    %73 = memref.load %arg0[%c0_27] : memref<1xf32, #tpu.memory_space<smem>>
    %74 = arith.addf %42, %64 : vector<1x1xf32>
    %75 = vector.broadcast %73 : f32 to vector<1x1xf32>
    %76 = arith.mulf %75, %72 : vector<1x1xf32>
    %77 = arith.addf %74, %76 : vector<1x1xf32>
    %78 = vector.extract %42[0, 0] : f32 from vector<1x1xf32>
    %c0_28 = arith.constant 0 : index
    %79 = memref.load %arg5[%c0_28] : memref<4xf32, #tpu.memory_space<smem>>
    memref.store %78, %arg5[%c0_28] : memref<4xf32, #tpu.memory_space<smem>>
    %80 = vector.extract %64[0, 0] : f32 from vector<1x1xf32>
    %c1 = arith.constant 1 : index
    %81 = memref.load %arg5[%c1] : memref<4xf32, #tpu.memory_space<smem>>
    memref.store %80, %arg5[%c1] : memref<4xf32, #tpu.memory_space<smem>>
    %82 = vector.extract %72[0, 0] : f32 from vector<1x1xf32>
    %c2 = arith.constant 2 : index
    %83 = memref.load %arg5[%c2] : memref<4xf32, #tpu.memory_space<smem>>
    memref.store %82, %arg5[%c2] : memref<4xf32, #tpu.memory_space<smem>>
    %84 = vector.extract %77[0, 0] : f32 from vector<1x1xf32>
    %c3 = arith.constant 3 : index
    %85 = memref.load %arg5[%c3] : memref<4xf32, #tpu.memory_space<smem>>
    memref.store %84, %arg5[%c3] : memref<4xf32, #tpu.memory_space<smem>>
    return
  }
}

</mosaic_0001>

<bundles_post_ra>
// kernel: tpu_custom_call.1
= control target key start
LH: loop header
LB: loop body
LE: loop exit
PB: predicated region body
PF: predicated region fallthrough
CT: control target
= control target key end

     0   :  { %11 = vsyncpa [#allocation4], 0  ;;  %s259_s0 = inlined_call_operand.<no memory space> [shape: f32[1], index: 0, kind: input, shape index: {}]   ;;  %s260_s1 = inlined_call_operand.vmem [shape: f32[2,5], index: 1, kind: input, shape index: {}]   ;;  %s261_s2 = inlined_call_operand.hbm [shape: f32[2,5], index: 2, kind: input, shape index: {}]   ;;  %s262_s3 = inlined_call_operand.vmem [shape: f32[2,5], index: 3, kind: input, shape index: {}]   ;;  %s263_s4 = inlined_call_operand.vmem [shape: f32[2,8], index: 4, kind: input, shape index: {}]   ;;  %s264_s5 = inlined_call_operand.hbm [shape: f32[4], index: 5, kind: output, shape index: {}]  }
   0x1   :  { %12 = vsyncpa [#allocation5], 0  ;;  %s206_s18 = smov [#allocation3]  }
   0x2   :  { %s23_s19 = sshll.u32 %s206_s18, 4  ;;  %s24_s19 = int_to_ptr.vmem [resolvable:$true] %s23_s19 }
   0x3   :  { %s182_s20 = scalar_lea.vmem %s24_s19, 32  ;;  %p187_p1 = scmp.lt.s32.totalorder %s24_s19, %s24_s19 }
   0x4   :  { %p183_p0 = scmp.ne.s32.totalorder %s24_s19, %s182_s20  ;;  %p188_p2 = scmp.lt.s32.totalorder %s182_s20, %s182_s20 }
   0x6   :  { %p189_p3 = por %p188_p2, %p187_p1 }
   0x8   :  { %p190_p4 = pnand %p189_p3, %p183_p0 }
   0xa   :  { %193 = shalt.err (!%p190_p4)
}
   0xb   :  { %26 = dma.hbm_to_vmem [thread:$0]  %s261_s2, 32, %s24_s19, [#allocation4]  }
   0xc   :  { %202 = dma.done.wait [#allocation4], 32  }
   0xd   :  { %203 = vsyncadd [#allocation4], 4294967264  ;;  %vm38_vm0 = vcmask 33792   ;;  %v34_v0 = vld [vmem:[%s262_s3] sm:$0x3]  ;;  %v47_v8 = vlaneseq  ;;  %vm102_vm2 = vcmask 58368  }
   0xe   :  { %v39_v1 = vsel %vm38_vm0, %v34_v0, 0.0  ;;  %v36_v2 = vld [vmem:[#allocation3] sm:$0x3]  ;;  %s207_s9 = smov [#allocation6]  }
   0xf   :  { %40 = vadd.xlane.f32.xlu0 %v39_v1  ;;  %v35_v3 = vld [vmem:[%s260_s1] sm:$0x3]  ;;  %v80_v4 = vsub.f32 1.0, %v36_v2  ;;  %162 = vlog2.f32 %v36_v2  ;;  %v48_v10 = vand.u32 127, %v47_v8 }
  0x10   :  { %v56_v5 = vsub.f32 1.0, %v35_v3  ;;  %v37_v31 = vld [vmem:[%s263_s4] sm:$0x3] }
  0x11   :  { %164 = vlog2.f32 %v80_v4  ;;  %vm49_vm1 = vcmp.eq.s32.totalorder %v48_v10, 4  ;;  %v101_v37 = vand.u32 2147483647, %v37_v31  ;;  %v117_v4 = vstv %s259_s0 }
  0x12   :  { %166 = vlog2.f32 %v35_v3  ;;  %v50_v19 = vsel %vm49_vm1, 1.0, %v34_v0 }
  0x13   :  { %168 = vlog2.f32 %v56_v5  ;;  %v103_v41 = vsel %vm102_vm2, %v101_v37, 0.0 }
  0x1c   :  { %v163_v9 = vpop.eup %162 }
  0x1d   :  { %v78_v14 = vmul.f32 0.6931472, %v163_v9 }
  0x1e   :  { %v165_v11 = vpop.eup %164 }
  0x1f   :  { %v167_v12 = vpop.eup %166  ;;  %v82_v15 = vmul.f32 0.6931472, %v165_v11  ;;  %v79_v21 = vmax.f32 %v78_v14, -100.0 }
  0x20   :  { %v169_v13 = vpop.eup %168  ;;  %v54_v16 = vmul.f32 0.6931472, %v167_v12 }
  0x21   :  { %v58_v17 = vmul.f32 0.6931472, %v169_v13  ;;  %v83_v22 = vmax.f32 %v82_v15, -100.0 }
  0x22   :  { %v55_v26 = vmax.f32 %v54_v16, -100.0 }
  0x23   :  { %v59_v27 = vmax.f32 %v58_v17, -100.0 }
  0x98   :  { %v41_v6 = vpop.xlane.xlu0 %40 }
  0x99   :  { %v42_v7 = vadd.f32 1.0, %v41_v6  ;;  %170 = vrcp.f32 %v41_v6 }
  0x9b   :  { %172 = vrcp.f32 %v42_v7 }
  0xa6   :  { %v171_v18 = vpop.eup %170 }
  0xa7   :  { %v52_v20 = vmul.f32 %v171_v18, %v34_v0 }
  0xa8   :  { %v173_v23 = vpop.eup %172 }
  0xa9   :  { %v85_v24 = vsub.f32 1.0, %v52_v20  ;;  %v51_v25 = vmul.f32 %v173_v23, %v50_v19  ;;  %v84_v28 = vmul.f32 %v79_v21, %v52_v20 }
  0xab   :  { %v86_v29 = vmul.f32 %v85_v24, %v83_v22  ;;  %v61_v30 = vsub.f32 1.0, %v51_v25  ;;  %v60_v33 = vmul.f32 %v55_v26, %v51_v25 }
  0xad   :  { %v87_v32 = vadd.f32 %v86_v29, %v84_v28  ;;  %v62_v34 = vmul.f32 %v61_v30, %v59_v27 }
  0xaf   :  { %v88_v35 = vsub.f32 0.0, %v87_v32  ;;  %v63_v36 = vadd.f32 %v62_v34, %v60_v33 }
  0xb1   :  { %v89_v38 = vsel %vm38_vm0, %v88_v35, 0.0  ;;  %v64_v39 = vsub.f32 0.0, %v63_v36 }
  0xb2   :  { %90 = vadd.xlane.f32.xlu1 %v89_v38 }
  0xb3   :  { %v65_v40 = vsel %vm38_vm0, %v64_v39, 0.0 }
  0xb4   :  { %66 = vadd.xlane.f32.xlu0 %v65_v40 }
  0xb6   :  { %104 = vadd.xlane.f32.xlu1 %v103_v41 }
 0x13b   :  { %v91_v42 = vpop.xlane.xlu1 %90 }
 0x13c   :  { %v92_v43 = vrot.slane %v91_v42, 4 }
 0x13d   :  { %v67_v44 = vpop.xlane.xlu0 %66 }
 0x13e   :  { %v93_v45 = vadd.f32 %v92_v43, %v91_v42  ;;  %v68_v46 = vrot.slane %v67_v44, 4 }
 0x13f   :  { %v105_v47 = vpop.xlane.xlu1 %104 }
 0x140   :  { %v94_v48 = vrot.slane %v93_v45, 2  ;;  %v69_v49 = vadd.f32 %v68_v46, %v67_v44  ;;  %v106_v50 = vrot.slane %v105_v47, 4 }
 0x142   :  { %v70_v51 = vrot.slane %v69_v49, 2  ;;  %v107_v52 = vadd.f32 %v106_v50, %v105_v47  ;;  %v95_v53 = vadd.f32 %v94_v48, %v93_v45 }
 0x144   :  { %v108_v54 = vrot.slane %v107_v52, 2  ;;  %v71_v55 = vadd.f32 %v70_v51, %v69_v49  ;;  %v96_v56 = vrot.slane %v95_v53, 1 }
 0x146   :  { %v109_v57 = vadd.f32 %v108_v54, %v107_v52  ;;  %v72_v58 = vrot.slane %v71_v55, 1  ;;  %v97_v61 = vadd.f32 %v96_v56, %v95_v53 }
 0x148   :  { %v73_v59 = vadd.f32 %v72_v58, %v71_v55  ;;  %v110_v60 = vrot.slane %v109_v57, 1 }
 0x14a   :  { %146 = vpush %v73_v59  ;;  %v111_v62 = vadd.f32 %v110_v60, %v109_v57 }
 0x14b   :  { %148 = vpush %v97_v61 }
 0x14c   :  { %150 = vpush %v111_v62 }
 0x17b   :  { %s147_s3 = spop %146 }
 0x17c   :  { %v75_v63 = vstv %s147_s3  ;;  %s149_s4 = spop %148 }
 0x17d   :  { %v76_v0 = vmul.f32 0.1, %v75_v63  ;;  %v99_v1 = vstv %s149_s4  ;;  %s151_s27 = spop %150 }
 0x17e   :  { %v100_v2 = vmul.f32 0.1, %v99_v1  ;;  %v113_v3 = vstv %s151_s27 }
 0x17f   :  { %v114_v5 = vmul.f32 0.5, %v113_v3  ;;  %152 = vpush %v76_v0 }
 0x180   :  { %154 = vpush %v100_v2  ;;  %v116_v6 = vadd.f32 %v100_v2, %v76_v0 }
 0x181   :  { %v118_v7 = vmul.f32 %v117_v4, %v114_v5  ;;  %156 = vpush %v114_v5 }
 0x183   :  { %v119_v8 = vadd.f32 %v118_v7, %v116_v6 }
 0x185   :  { %158 = vpush %v119_v8 }
 0x1b0   :  { %s153_s30 = spop %152 }
 0x1b1   :  { %122 = sst [smem:[#allocation6]] %s153_s30  ;;  %s155_s6 = spop %154 }
 0x1b2   :  { %125 = sst [smem:[#allocation6 + $0x1]] %s155_s6  ;;  %s157_s7 = spop %156 }
 0x1b3   :  { %128 = sst [smem:[#allocation6 + $0x2]] %s157_s7 }
 0x1b6   :  { %s159_s8 = spop %158 }
 0x1b7   :  { %131 = sst [smem:[#allocation6 + $0x3]] %s159_s8 }
 0x1b8   :  { %139 = dma.smem_to_hbm %s207_s9, 16, %s264_s5, [#allocation5]  }
 0x1b9   :  { %204 = dma.done.wait [#allocation5], 16  }
 0x1ba   :  { %205 = vsyncadd [#allocation5], 4294967280 }
 0x1bb   :  { %143 = sfence }
 0x1bc   :  { %144 = vsyncpa [#allocation4], 1 }
 0x1bd   :  { %145 = vsyncpa [#allocation5], 1 }

</bundles_post_ra>
